<compile_context>
chip_gen: v7x
topology: tpu7x:2x2x1
jax: 0.10.0
libtpu: 0.0.40
codegen_flags: <defaults>
</compile_context>

<pallas_src>
import math
import functools

import numpy as np
import jax
import jax.numpy as jnp
from jax.experimental import pallas as pl
from jax.experimental.pallas import tpu as pltpu


def _round_up(x, m):
    return ((x + m - 1) // m) * m


def _cast_pad(a, dtype, pads):
    """Cast and zero-pad, skipping each step if it is a no-op."""
    if a.dtype != dtype:
        a = a.astype(dtype)
    if any(hi for _, hi in pads):
        a = jnp.pad(a, pads)
    return a


# ---------------------------------------------------------------------------
# Kernel 1: support = X @ W   (computed exactly once; no per-row-tile redo)
# ---------------------------------------------------------------------------
def _support_kernel(x_ref, w_ref, s_ref):
    s_ref[...] = jnp.dot(
        x_ref[...], w_ref[...], preferred_element_type=jnp.float32
    ).astype(s_ref.dtype)


# ---------------------------------------------------------------------------
# Kernel 2: out = adj @ support (+ bias)
# ---------------------------------------------------------------------------
def _agg_kernel_acc(adj_ref, s_ref, b_ref, out_ref, acc_ref):
    """Variant with an f32 scratch accumulator (non-f32 output dtypes)."""
    k = pl.program_id(2)

    @pl.when(k == 0)
    def _():
        acc_ref[...] = jnp.zeros_like(acc_ref)

    acc_ref[...] += jnp.dot(
        adj_ref[...], s_ref[...], preferred_element_type=jnp.float32
    )

    @pl.when(k == pl.num_programs(2) - 1)
    def _():
        out_ref[...] = (acc_ref[...] + b_ref[...]).astype(out_ref.dtype)


def _agg_kernel_inplace(adj_ref, s_ref, b_ref, out_ref):
    """f32 output: accumulate directly into the resident out block (no scratch)."""
    k = pl.program_id(2)

    @pl.when(k == 0)
    def _():
        out_ref[...] = jnp.zeros_like(out_ref)

    out_ref[...] += jnp.dot(
        adj_ref[...], s_ref[...], preferred_element_type=jnp.float32
    )

    @pl.when(k == pl.num_programs(2) - 1)
    def _():
        out_ref[...] += b_ref[...]


# ---------------------------------------------------------------------------
# Wrapper
# ---------------------------------------------------------------------------
@functools.partial(
    jax.jit, static_argnames=("block_m", "block_k", "block_n", "compute_dtype")
)
def graph_convolution(x, adj, weight, bias=None, *,
                      block_m=512, block_k=1024, block_n=512,
                      compute_dtype=jnp.bfloat16):
    """Fused GCN layer forward: adj @ (x @ weight) [+ bias]."""
    n, f_in = x.shape
    f_out = weight.shape[1]
    out_dtype = x.dtype
    cdt = compute_dtype

    # ---- tile sizes / padded shapes -----------------------------------------
    f_in_p = _round_up(f_in, 128)
    f_out_p = _round_up(f_out, 128)

    n128 = _round_up(n, 128)
    tm = min(block_m, n128)
    tk = min(block_k, n128)
    # Force tk to be a multiple of tm (both are multiples of 128) so padding N
    # only to tk satisfies both tile sizes -- no LCM blow-up, no extra adj copy.
    if tk % tm:
        tk = max(tm, (tk // tm) * tm)
    n_pad = _round_up(n, max(tm, tk))

    # Prefer >= 2 blocks along the 'parallel' row axis (v7x megacore balance,
    # and row-tile pipelining of adj on single-core parts).
    if n_pad // tm < 2:
        half = tm // 2
        if half >= 8 and half % 8 == 0 and n_pad % half == 0:
            tm = half

    # Optional F_out tiling keeps acc/out/weight tiles bounded for wide layers.
    if f_out_p > block_n:
        f_out_p = _round_up(f_out_p, block_n)
        tn = block_n
    else:
        tn = f_out_p

    # ---- pad / cast operands (skipped when already aligned & right dtype) ---
    # x must stay zero-padded so padded adj columns multiply zero support rows.
    x_p = _cast_pad(x, cdt, ((0, n_pad - n), (0, f_in_p - f_in)))
    w_p = _cast_pad(weight, cdt, ((0, f_in_p - f_in), (0, f_out_p - f_out)))
    adj_p = _cast_pad(adj, cdt, ((0, n_pad - n), (0, n_pad - n)))
    if bias is None:
        b_p = jnp.zeros((1, f_out_p), jnp.float32)
    else:
        b_p = jnp.pad(bias.astype(jnp.float32),
                      (0, f_out_p - f_out)).reshape(1, f_out_p)

    # ---- kernel 1: support = X @ W  (once, stored in compute dtype) ---------
    # TODO(synk): add a reduction grid axis over F_in for very wide inputs; the
    # (f_in_p, tn) weight block is kept fully VMEM-resident here.
    support = pl.pallas_call(
        _support_kernel,
        out_shape=jax.ShapeDtypeStruct((n_pad, f_out_p), cdt),
        grid=(n_pad // tm, f_out_p // tn),
        in_specs=[
            pl.BlockSpec((tm, f_in_p), lambda i, j: (i, 0)),     # x row tile
            pl.BlockSpec((f_in_p, tn), lambda i, j: (0, j)),     # weight column tile
        ],
        out_specs=pl.BlockSpec((tm, tn), lambda i, j: (i, j)),
        compiler_params=pltpu.CompilerParams(
            dimension_semantics=("parallel", "parallel"),
        ),
    )(x_p, w_p)

    # ---- kernel 2: out = adj @ support (+ bias) ------------------------------
    acc_in_out = out_dtype == jnp.float32
    cbytes = np.dtype(cdt).itemsize
    obytes = np.dtype(out_dtype).itemsize
    vmem_need = (2 * tm * tk * cbytes                  # adj, double-buffered
                 + 2 * tk * tn * cbytes                # support, double-buffered
                 + 2 * tm * tn * obytes                # out, double-buffered
                 + (0 if acc_in_out else tm * tn * 4)  # acc scratch
                 + 2 * tn * 4)                         # bias
    # Cap at 56 MiB: safe on v7x's 64 MiB physical VMEM, plenty on v5e/v6e.
    vmem_limit = int(min(max(4 * vmem_need, 32 * 1024 * 1024), 56 * 1024 * 1024))

    kernel = _agg_kernel_inplace if acc_in_out else _agg_kernel_acc
    scratch = [] if acc_in_out else [pltpu.VMEM((tm, tn), jnp.float32)]

    out_p = pl.pallas_call(
        kernel,
        out_shape=jax.ShapeDtypeStruct((n_pad, f_out_p), out_dtype),
        grid=(n_pad // tm, f_out_p // tn, n_pad // tk),
        in_specs=[
            # TODO(synk): bump adj to pipeline_mode=pl.Buffered(3) if profiling
            # shows exposed DMA; adj carries essentially all the HBM traffic.
            pl.BlockSpec((tm, tk), lambda i, j, k: (i, k)),      # adj tile
            pl.BlockSpec((tk, tn), lambda i, j, k: (k, j)),      # support tile
            pl.BlockSpec((1, tn), lambda i, j, k: (0, j)),       # bias row
        ],
        out_specs=pl.BlockSpec((tm, tn), lambda i, j, k: (i, j)),
        scratch_shapes=scratch,
        compiler_params=pltpu.CompilerParams(
            dimension_semantics=("parallel", "parallel", "arbitrary"),
            vmem_limit_bytes=vmem_limit,
        ),
    )(adj_p, support, b_p)

    return out_p[:n, :f_out]


def init_gcn_params(key, in_features, out_features, bias=False, dtype=jnp.float32):
    """Re-implementation of GraphConvolution.reset_parameters() (uniform +-stdv)."""
    stdv = 1.0 / math.sqrt(out_features)
    kw, kb = jax.random.split(key)
    weight = jax.random.uniform(
        kw, (in_features, out_features), dtype=dtype, minval=-stdv, maxval=stdv
    )
    b = None
    if bias:
        b = jax.random.uniform(
            kb, (out_features,), dtype=dtype, minval=-stdv, maxval=stdv
        )
    return weight, b


if __name__ == "__main__":
    key = jax.random.PRNGKey(0)
    k_x, k_adj, k_param = jax.random.split(key, 3)

    # Small but non-trivial shapes: exercises F_in/F_out padding to 128 lanes,
    # the row-axis split into 2 'parallel' blocks, and both agg-kernel variants.
    N, F_IN, F_OUT = 384, 48, 96
    dtype = jnp.float32

    x = jax.random.normal(k_x, (N, F_IN), dtype=dtype)
    a = jax.random.uniform(k_adj, (N, N), dtype=dtype)
    adj = (a + a.T) * 0.5  # symmetric dense adjacency

    weight, bias = init_gcn_params(k_param, F_IN, F_OUT, bias=True, dtype=dtype)

    # --- exact f32 compute path, with bias ------------------------------------
    out = jax.block_until_ready(
        graph_convolution(x, adj, weight, bias, compute_dtype=jnp.float32)
    )
    ref = adj @ (x @ weight) + bias
    assert out.shape == (N, F_OUT)
    assert out.dtype == dtype
    assert jnp.allclose(out, ref, atol=2e-3, rtol=2e-3), "f32 bias path mismatch"

    # --- exact f32 compute path, no bias (module default bias=False) ----------
    out_nb = jax.block_until_ready(
        graph_convolution(x, adj, weight, compute_dtype=jnp.float32)
    )
    ref_nb = adj @ (x @ weight)
    assert jnp.allclose(out_nb, ref_nb, atol=2e-3, rtol=2e-3), "no-bias path mismatch"

    # --- default bf16 compute path (f32 MXU accumulation, f32 output) ---------
    out_bf = jax.block_until_ready(graph_convolution(x, adj, weight, bias))
    xb = x.astype(jnp.bfloat16)
    wb = weight.astype(jnp.bfloat16)
    sb = jnp.dot(xb, wb, preferred_element_type=jnp.float32).astype(jnp.bfloat16)
    ref_bf = jnp.dot(adj.astype(jnp.bfloat16), sb,
                     preferred_element_type=jnp.float32) + bias
    assert out_bf.dtype == dtype
    assert jnp.allclose(out_bf, ref_bf, atol=2e-1, rtol=5e-2), "bf16 path mismatch"

    print("KERNEL_OK")
</pallas_src>

<mosaic_0001>
module attributes {stable_mosaic.version = 11 : i64} {
  func.func @_support_kernel(%arg0: i32, %arg1: i32, %arg2: memref<192x128xf32, #tpu.memory_space<vmem>>, %arg3: memref<128x128xf32, #tpu.memory_space<vmem>>, %arg4: memref<192x128xf32, #tpu.memory_space<vmem>>) attributes {dimension_semantics = [#tpu.dimension_semantics<parallel>, #tpu.dimension_semantics<parallel>], iteration_bounds = array<i64: 2, 1>, scalar_prefetch = 0 : i64, scratch_operands = 0 : i64, tpu.core_type = #tpu.core_type<tc>, window_params = [{transform_indices = @transform_0, window_bounds = array<i64: 192, 128>}, {transform_indices = @transform_1, window_bounds = array<i64: 128, 128>}, {transform_indices = @transform_2, window_bounds = array<i64: 192, 128>}]} {
    %c0 = arith.constant 0 : index
    %c0_0 = arith.constant 0 : index
    %0 = vector.load %arg2[%c0, %c0_0] : memref<192x128xf32, #tpu.memory_space<vmem>>, vector<192x128xf32>
    %c0_1 = arith.constant 0 : index
    %c0_2 = arith.constant 0 : index
    %1 = vector.load %arg3[%c0_1, %c0_2] : memref<128x128xf32, #tpu.memory_space<vmem>>, vector<128x128xf32>
    %cst = arith.constant dense<0.000000e+00> : vector<192x128xf32>
    %2 = tpu.matmul %0, %1, %cst {dimension_numbers = #tpu.dot_dimension_numbers<[1], [0], [0], [1], [0, 0, 1, 1], [], []>} : vector<192x128xf32>, vector<128x128xf32>, vector<192x128xf32> -> vector<192x128xf32>
    %c0_3 = arith.constant 0 : index
    %c0_4 = arith.constant 0 : index
    %3 = vector.load %arg4[%c0_3, %c0_4] : memref<192x128xf32, #tpu.memory_space<vmem>>, vector<192x128xf32>
    tpu.vector_store %arg4[%c0_3, %c0_4], %2 {strides = array<i32>} : memref<192x128xf32, #tpu.memory_space<vmem>>, vector<192x128xf32>,
    return
  }
  func.func @transform_0(%arg0: i32, %arg1: i32) -> (i32, i32) {
    %c0_i32 = arith.constant 0 : i32
    %c0_i32_0 = arith.constant 0 : i32
    return %arg0, %c0_i32 : i32, i32
  }
  func.func @transform_1(%arg0: i32, %arg1: i32) -> (i32, i32) {
    %c0_i32 = arith.constant 0 : i32
    %c0_i32_0 = arith.constant 0 : i32
    return %c0_i32, %arg1 : i32, i32
  }
  func.func @transform_2(%arg0: i32, %arg1: i32) -> (i32, i32) {
    %c0_i32 = arith.constant 0 : i32
    return %arg0, %arg1 : i32, i32
  }
}

module attributes {stable_mosaic.version = 11 : i64} {
  func.func @_agg_kernel_inplace(%arg0: i32, %arg1: i32, %arg2: i32, %arg3: memref<192x384xf32, #tpu.memory_space<vmem>>, %arg4: memref<384x128xf32, #tpu.memory_space<vmem>>, %arg5: memref<1x128xf32, #tpu.memory_space<vmem>>, %arg6: memref<192x128xf32, #tpu.memory_space<vmem>>) attributes {dimension_semantics = [#tpu.dimension_semantics<parallel>, #tpu.dimension_semantics<parallel>, #tpu.dimension_semantics<arbitrary>], iteration_bounds = array<i64: 2, 1, 1>, scalar_prefetch = 0 : i64, scratch_operands = 0 : i64, tpu.core_type = #tpu.core_type<tc>, window_params = [{transform_indices = @transform_0, window_bounds = array<i64: 192, 384>}, {transform_indices = @transform_1, window_bounds = array<i64: 384, 128>}, {transform_indices = @transform_2, window_bounds = array<i64: 1, 128>}, {transform_indices = @transform_3, window_bounds = array<i64: 192, 128>}]} {
    %c0_i32 = arith.constant 0 : i32
    %0 = arith.cmpi eq, %arg2, %c0_i32 : i32
    %1 = arith.extui %0 : i1 to i32
    %c0_i32_0 = arith.constant 0 : i32
    %2 = arith.cmpi ne, %1, %c0_i32_0 : i32
    scf.if %2 {
      %cst_10 = arith.constant 0.000000e+00 : f32
      %12 = vector.broadcast %cst_10 : f32 to vector<192x128xf32>
      %c0_11 = arith.constant 0 : index
      %c0_12 = arith.constant 0 : index
      %13 = vector.load %arg6[%c0_11, %c0_12] : memref<192x128xf32, #tpu.memory_space<vmem>>, vector<192x128xf32>
      tpu.vector_store %arg6[%c0_11, %c0_12], %12 {strides = array<i32>} : memref<192x128xf32, #tpu.memory_space<vmem>>, vector<192x128xf32>,
    } else {
    }
    %c0 = arith.constant 0 : index
    %c0_1 = arith.constant 0 : index
    %3 = vector.load %arg6[%c0, %c0_1] : memref<192x128xf32, #tpu.memory_space<vmem>>, vector<192x128xf32>
    %c0_2 = arith.constant 0 : index
    %c0_3 = arith.constant 0 : index
    %4 = vector.load %arg3[%c0_2, %c0_3] : memref<192x384xf32, #tpu.memory_space<vmem>>, vector<192x384xf32>
    %c0_4 = arith.constant 0 : index
    %c0_5 = arith.constant 0 : index
    %5 = vector.load %arg4[%c0_4, %c0_5] : memref<384x128xf32, #tpu.memory_space<vmem>>, vector<384x128xf32>
    %cst = arith.constant dense<0.000000e+00> : vector<192x128xf32>
    %6 = tpu.matmul %4, %5, %cst {dimension_numbers = #tpu.dot_dimension_numbers<[1], [0], [0], [1], [0, 0, 1, 1], [], []>} : vector<192x384xf32>, vector<384x128xf32>, vector<192x128xf32> -> vector<192x128xf32>
    %7 = arith.addf %3, %6 : vector<192x128xf32>
    %c0_6 = arith.constant 0 : index
    %c0_7 = arith.constant 0 : index
    %8 = vector.load %arg6[%c0_6, %c0_7] : memref<192x128xf32, #tpu.memory_space<vmem>>, vector<192x128xf32>
    tpu.vector_store %arg6[%c0_6, %c0_7], %7 {strides = array<i32>} : memref<192x128xf32, #tpu.memory_space<vmem>>, vector<192x128xf32>,
    %c0_i32_8 = arith.constant 0 : i32
    %9 = arith.cmpi eq, %arg2, %c0_i32_8 : i32
    %10 = arith.extui %9 : i1 to i32
    %c0_i32_9 = arith.constant 0 : i32
    %11 = arith.cmpi ne, %10, %c0_i32_9 : i32
    scf.if %11 {
      %c0_10 = arith.constant 0 : index
      %c0_11 = arith.constant 0 : index
      %12 = vector.load %arg6[%c0_10, %c0_11] : memref<192x128xf32, #tpu.memory_space<vmem>>, vector<192x128xf32>
      %c0_12 = arith.constant 0 : index
      %c0_13 = arith.constant 0 : index
      %13 = vector.load %arg5[%c0_12, %c0_13] : memref<1x128xf32, #tpu.memory_space<vmem>>, vector<1x128xf32>
      %14 = vector.broadcast %13 : vector<1x128xf32> to vector<192x128xf32>
      %15 = arith.addf %12, %14 : vector<192x128xf32>
      %c0_14 = arith.constant 0 : index
      %c0_15 = arith.constant 0 : index
      %16 = vector.load %arg6[%c0_14, %c0_15] : memref<192x128xf32, #tpu.memory_space<vmem>>, vector<192x128xf32>
      tpu.vector_store %arg6[%c0_14, %c0_15], %15 {strides = array<i32>} : memref<192x128xf32, #tpu.memory_space<vmem>>, vector<192x128xf32>,
    } else {
    }
    return
  }
  func.func @transform_0(%arg0: i32, %arg1: i32, %arg2: i32) -> (i32, i32) {
    %c0_i32 = arith.constant 0 : i32
    return %arg0, %arg2 : i32, i32
  }
  func.func @transform_1(%arg0: i32, %arg1: i32, %arg2: i32) -> (i32, i32) {
    %c0_i32 = arith.constant 0 : i32
    return %arg2, %arg1 : i32, i32
  }
  func.func @transform_2(%arg0: i32, %arg1: i32, %arg2: i32) -> (i32, i32) {
    %c0_i32 = arith.constant 0 : i32
    %c0_i32_0 = arith.constant 0 : i32
    return %c0_i32, %arg1 : i32, i32
  }
  func.func @transform_3(%arg0: i32, %arg1: i32, %arg2: i32) -> (i32, i32) {
    %c0_i32 = arith.constant 0 : i32
    return %arg0, %arg1 : i32, i32
  }
}

</mosaic_0001>

<bundles_post_ra>
// kernel: graph_convolution.2
= control target key start
LH: loop header
LB: loop body
LE: loop exit
PB: predicated region body
PF: predicated region fallthrough
CT: control target
= control target key end

     0   :  { %s752_s9 = smov 0   ;;  %s754_s10 = smov 0   ;;  %s892_s0 = inlined_call_operand.vmem [shape: f32[384,128], index: 0, kind: input, shape index: {}]   ;;  %s893_s1 = inlined_call_operand.vmem [shape: f32[128,128], index: 1, kind: input, shape index: {}]   ;;  %s894_s2 = inlined_call_operand.vmem [shape: f32[384,128], index: 2, kind: output, shape index: {}]  }
   0x1   :  { %s756_s11 = smov 0  }
   0x2 LB: > { %s24_s12 = sadd.s32 1, %s731_s10  ;;  %p528_p0 = scmp.ge.s32.totalorder %s735_s11, 1  ;;  %s735_s11 = sphi %s756_s11, %s12_s11   ;;  %s731_s10 = sphi %s754_s10, %s896_s10   ;;  %s727_s9 = sphi %s752_s9, %s895_s9  }
   0x3   : > { %p26_p1 = scmp.ge.s32.totalorder %s24_s12, 2  ;;  %p136_p2 = scmp.lt.s32.totalorder %s735_s11, 3 }
   0x5   : > { %s898_s12 = smov (%p26_p1, %s24_s12), 0  ;;  %p137_p3 = pnand %p528_p0, %p136_p2 }
   0x6   : > { %v208_v0 = vld [vmem:[%s893_s1] sm:$0xff] (!%p137_p3)  ;;  %v209_v1 = vld [vmem:[%s893_s1 + $0x8] sm:$0xff] (!%p137_p3)  ;;  %v210_v2 = vld [vmem:[%s893_s1 + $0x10] sm:$0xff] (!%p137_p3)  ;;  %s165_s19 = smul.u32 (!%p137_p3), 24, %s727_s9 }
   0x7   : > { %140 = sbr.rel (%p137_p3) target bundleno = 276 (0x114), region = 28  ;;  %v641_v3 = vpack.c.bf16 (!%p137_p3), %v209_v1, %v208_v0  ;;  %v211_v4 = vld [vmem:[%s893_s1 + $0x18] sm:$0xff] (!%p137_p3)  ;;  %v212_v6 = vld [vmem:[%s893_s1 + $0x20] sm:$0xff] (!%p137_p3)  ;;  %v213_v7 = vld [vmem:[%s893_s1 + $0x28] sm:$0xff] (!%p137_p3) }
   0x8   : > { %v645_v5 = vpack.c.bf16 (!%p137_p3), %v211_v4, %v210_v2  ;;  %p166_p4 = scmp.lt.s32.totalorder (!%p137_p3), %s165_s19, 47  ;;  %v649_v8 = vpack.c.bf16 (!%p137_p3), %v213_v7, %v212_v6  ;;  %v214_v9 = vld [vmem:[%s893_s1 + $0x30] sm:$0xff] (!%p137_p3)  ;;  %v215_v10 = vld [vmem:[%s893_s1 + $0x38] sm:$0xff] (!%p137_p3)  ;;  %v216_v14 = vld [vmem:[%s893_s1 + $0x40] sm:$0xff] (!%p137_p3) }
   0x9   : > { %642 = vmatprep.subr.bf16.mxu0 (!%p137_p3), %v641_v3  ;;  %673 = vmatprep.subr.bf16.mxu1 (!%p137_p3), %v641_v3  ;;  %v653_v13 = vpack.c.bf16 (!%p137_p3), %v215_v10, %v214_v9  ;;  %v217_v15 = vld [vmem:[%s893_s1 + $0x48] sm:$0xff] (!%p137_p3)  ;;  %v218_v17 = vld [vmem:[%s893_s1 + $0x50] sm:$0xff] (!%p137_p3)  ;;  %v219_v18 = vld [vmem:[%s893_s1 + $0x58] sm:$0xff] (!%p137_p3) }
   0xa   : > { %644 = vmatpush3.bf16.msra.mxu0 (!%p137_p3), %v641_v3  ;;  %681 = vmatpush3.bf16.msra.mxu1 (!%p137_p3), %v641_v3  ;;  %v657_v16 = vpack.c.bf16 (!%p137_p3), %v217_v15, %v216_v14  ;;  %v661_v19 = vpack.c.bf16 (!%p137_p3), %v219_v18, %v218_v17  ;;  %v220_v20 = vld [vmem:[%s893_s1 + $0x60] sm:$0xff] (!%p137_p3)  ;;  %v221_v21 = vld [vmem:[%s893_s1 + $0x68] sm:$0xff] (!%p137_p3)  ;;  %v222_v23 = vld [vmem:[%s893_s1 + $0x70] sm:$0xff] (!%p137_p3) }
   0xb   : > { %646 = vmatprep.subr.bf16.mxu0 (!%p137_p3), %v645_v5  ;;  %674 = vmatprep.subr.bf16.mxu1 (!%p137_p3), %v645_v5  ;;  %v665_v22 = vpack.c.bf16 (!%p137_p3), %v221_v21, %v220_v20  ;;  %v223_v24 = vld [vmem:[%s893_s1 + $0x78] sm:$0xff] (!%p137_p3) }
   0xc   : > { %v669_v25 = vpack.c.bf16 (!%p137_p3), %v223_v24, %v222_v23 }
   0xe   : > { %s900_s19 = smov (!%p166_p4, %s165_s19), 47  ;;  %648 = vmatpush3.bf16.msra.mxu0 %v645_v5  ;;  %682 = vmatpush3.bf16.msra.mxu1 %v645_v5 }
   0xf   : > { %s529_s30 = sshll.u32 %s900_s19, 3  ;;  %650 = vmatprep.subr.bf16.mxu0 %v649_v8  ;;  %675 = vmatprep.subr.bf16.mxu1 %v649_v8 }
  0x10   : > { %s802_s5 = scalar_lea.vmem %s892_s0, %s529_s30  ;;  %s857_s28 = scalar_lea.vmem %s894_s2, %s529_s30 }
  0x11   : > { %v184_v11 = vld [vmem:[%s802_s5] sm:$0xff]  ;;  %v185_v26 = vld [vmem:[%s802_s5 + $0x8] sm:$0xff]  ;;  %v186_v28 = vld [vmem:[%s802_s5 + $0x10] sm:$0xff] }
  0x12   : > { %v196_v12 = vld [vmem:[%s802_s5 + $0x60] sm:$0xff]  ;;  %605 = vmatprep.mubr.f32.mxu0 %v184_v11  ;;  %652 = vmatpush3.bf16.msra.mxu0 %v649_v8  ;;  %v197_v27 = vld [vmem:[%s802_s5 + $0x68] sm:$0xff]  ;;  %v198_v29 = vld [vmem:[%s802_s5 + $0x70] sm:$0xff] }
  0x13   : > { %623 = vmatprep.mubr.f32.mxu1 %v196_v12  ;;  %683 = vmatpush3.bf16.msra.mxu1 %v649_v8  ;;  %v187_v30 = vld [vmem:[%s802_s5 + $0x18] sm:$0xff]  ;;  %v188_v32 = vld [vmem:[%s802_s5 + $0x20] sm:$0xff]  ;;  %v189_v34 = vld [vmem:[%s802_s5 + $0x28] sm:$0xff] }
  0x14   : > { %654 = vmatprep.subr.bf16.mxu0 %v653_v13  ;;  %676 = vmatprep.subr.bf16.mxu1 %v653_v13  ;;  %v199_v31 = vld [vmem:[%s802_s5 + $0x78] sm:$0xff]  ;;  %v200_v33 = vld [vmem:[%s802_s5 + $0x80] sm:$0xff]  ;;  %v201_v35 = vld [vmem:[%s802_s5 + $0x88] sm:$0xff] }
  0x15   : > { %v190_v36 = vld [vmem:[%s802_s5 + $0x30] sm:$0xff]  ;;  %v191_v38 = vld [vmem:[%s802_s5 + $0x38] sm:$0xff]  ;;  %v192_v40 = vld [vmem:[%s802_s5 + $0x40] sm:$0xff] }
  0x16   : > { %656 = vmatpush3.bf16.msra.mxu0 %v653_v13  ;;  %v202_v37 = vld [vmem:[%s802_s5 + $0x90] sm:$0xff]  ;;  %v203_v39 = vld [vmem:[%s802_s5 + $0x98] sm:$0xff]  ;;  %v204_v41 = vld [vmem:[%s802_s5 + $0xa0] sm:$0xff] }
  0x17   : > { %684 = vmatpush3.bf16.msra.mxu1 %v653_v13  ;;  %658 = vmatprep.subr.bf16.mxu0 %v657_v16  ;;  %v193_v42 = vld [vmem:[%s802_s5 + $0x48] sm:$0xff]  ;;  %v194_v44 = vld [vmem:[%s802_s5 + $0x50] sm:$0xff]  ;;  %v195_v46 = vld [vmem:[%s802_s5 + $0x58] sm:$0xff] }
  0x18   : > { %677 = vmatprep.subr.bf16.mxu1 %v657_v16  ;;  %v205_v43 = vld [vmem:[%s802_s5 + $0xa8] sm:$0xff]  ;;  %v206_v45 = vld [vmem:[%s802_s5 + $0xb0] sm:$0xff]  ;;  %v207_v47 = vld [vmem:[%s802_s5 + $0xb8] sm:$0xff] }
  0x1a   : > { %660 = vmatpush3.bf16.msra.mxu0 %v657_v16 }
  0x1b   : > { %685 = vmatpush3.bf16.msra.mxu1 %v657_v16  ;;  %662 = vmatprep.subr.bf16.mxu0 %v661_v19 }
  0x1c   : > { %678 = vmatprep.subr.bf16.mxu1 %v661_v19 }
  0x1e   : > { %664 = vmatpush3.bf16.msra.mxu0 %v661_v19 }
  0x1f   : > { %686 = vmatpush3.bf16.msra.mxu1 %v661_v19  ;;  %666 = vmatprep.subr.bf16.mxu0 %v665_v22 }
  0x20   : > { %679 = vmatprep.subr.bf16.mxu1 %v665_v22 }
  0x22   : > { %668 = vmatpush3.bf16.msra.mxu0 %v665_v22 }
  0x23   : > { %687 = vmatpush3.bf16.msra.mxu1 %v665_v22  ;;  %670 = vmatprep.subr.bf16.mxu0 %v669_v25 }
  0x24   : > { %680 = vmatprep.subr.bf16.mxu1 %v669_v25 }
  0x26   : > { %672 = vmatpush3.bf16.msra.mxu0 %v669_v25 }
  0x27   : > { %688 = vmatpush3.bf16.msra.mxu1 %v669_v25 }
  0x29   : > { %606 = vmatmul.mubr.f32.vlgmr.msra.gmra.mrb[0].mxu0 %v185_v26 }
  0x2a   : > { %624 = vmatmul.mubr.f32.vlgmr.msra.gmra.mrb[0].mxu1 %v197_v27  ;;  %608 = vmatprep.mubr.f32.mxu0 %v186_v28 }
  0x2b   : > { %626 = vmatprep.mubr.f32.mxu1 %v198_v29 }
  0x2d   : > { %609 = vmatmul.mubr.f32.gmra.mrb[2].mxu0 %v187_v30 }
  0x2e   : > { %627 = vmatmul.mubr.f32.gmra.mrb[2].mxu1 %v199_v31  ;;  %611 = vmatprep.mubr.f32.mxu0 %v188_v32 }
  0x2f   : > { %629 = vmatprep.mubr.f32.mxu1 %v200_v33 }
  0x31   : > { %612 = vmatmul.mubr.f32.gmra.mrb[4].mxu0 %v189_v34 }
  0x32   : > { %630 = vmatmul.mubr.f32.gmra.mrb[4].mxu1 %v201_v35  ;;  %614 = vmatprep.mubr.f32.mxu0 %v190_v36 }
  0x33   : > { %632 = vmatprep.mubr.f32.mxu1 %v202_v37 }
  0x35   : > { %615 = vmatmul.mubr.f32.gmra.mrb[6].mxu0 %v191_v38 }
  0x36   : > { %633 = vmatmul.mubr.f32.gmra.mrb[6].mxu1 %v203_v39  ;;  %617 = vmatprep.mubr.f32.mxu0 %v192_v40 }
  0x37   : > { %635 = vmatprep.mubr.f32.mxu1 %v204_v41 }
  0x39   : > { %618 = vmatmul.mubr.f32.gmra.mrb[8].mxu0 %v193_v42 }
  0x3a   : > { %636 = vmatmul.mubr.f32.gmra.mrb[8].mxu1 %v205_v43  ;;  %620 = vmatprep.mubr.f32.mxu0 %v194_v44 }
  0x3b   : > { %638 = vmatprep.mubr.f32.mxu1 %v206_v45 }
  0x3d   : > { %621 = vmatmul.mubr.f32.gmra.mrb[10].mxu0 %v195_v46 }
  0x3e   : > { %639 = vmatmul.mubr.f32.gmra.mrb[10].mxu1 %v207_v47 }
  0xfc   : > { %v607_v48 = vpop.f32.mrb[0].mxu0 }
  0xfd   : > { %v625_v49 = vpop.f32.mrb[0].mxu1  ;;  %410 = vst [vmem:[%s857_s28 + $0x8] sm:$0xff] %v607_v48  ;;  %v290_v50 = vpop.f32.mrb[1].mxu0 }
  0xfe   : > { %422 = vst [vmem:[%s857_s28 + $0x68] sm:$0xff] %v625_v49  ;;  %v350_v51 = vpop.f32.mrb[1].mxu1  ;;  %409 = vst [vmem:[%s857_s28] sm:$0xff] %v290_v50 }
  0xff   : > { %421 = vst [vmem:[%s857_s28 + $0x60] sm:$0xff] %v350_v51 }
 0x100   : > { %v610_v52 = vpop.f32.mrb[2].mxu0 }
 0x101   : > { %v628_v53 = vpop.f32.mrb[2].mxu1  ;;  %412 = vst [vmem:[%s857_s28 + $0x18] sm:$0xff] %v610_v52  ;;  %v300_v54 = vpop.f32.mrb[3].mxu0 }
 0x102   : > { %424 = vst [vmem:[%s857_s28 + $0x78] sm:$0xff] %v628_v53  ;;  %v360_v55 = vpop.f32.mrb[3].mxu1  ;;  %411 = vst [vmem:[%s857_s28 + $0x10] sm:$0xff] %v300_v54 }
 0x103   : > { %423 = vst [vmem:[%s857_s28 + $0x70] sm:$0xff] %v360_v55 }
 0x104   : > { %v613_v56 = vpop.f32.mrb[4].mxu0 }
 0x105   : > { %v631_v57 = vpop.f32.mrb[4].mxu1  ;;  %414 = vst [vmem:[%s857_s28 + $0x28] sm:$0xff] %v613_v56  ;;  %v310_v58 = vpop.f32.mrb[5].mxu0 }
 0x106   : > { %426 = vst [vmem:[%s857_s28 + $0x88] sm:$0xff] %v631_v57  ;;  %v370_v59 = vpop.f32.mrb[5].mxu1  ;;  %413 = vst [vmem:[%s857_s28 + $0x20] sm:$0xff] %v310_v58 }
 0x107   : > { %425 = vst [vmem:[%s857_s28 + $0x80] sm:$0xff] %v370_v59 }
 0x108   : > { %v616_v60 = vpop.f32.mrb[6].mxu0 }
 0x109   : > { %v634_v61 = vpop.f32.mrb[6].mxu1  ;;  %416 = vst [vmem:[%s857_s28 + $0x38] sm:$0xff] %v616_v60  ;;  %v320_v62 = vpop.f32.mrb[7].mxu0 }
 0x10a   : > { %428 = vst [vmem:[%s857_s28 + $0x98] sm:$0xff] %v634_v61  ;;  %v380_v63 = vpop.f32.mrb[7].mxu1  ;;  %415 = vst [vmem:[%s857_s28 + $0x30] sm:$0xff] %v320_v62 }
 0x10b   : > { %427 = vst [vmem:[%s857_s28 + $0x90] sm:$0xff] %v380_v63 }
 0x10c   : > { %v619_v0 = vpop.f32.mrb[8].mxu0 }
 0x10d   : > { %v637_v1 = vpop.f32.mrb[8].mxu1  ;;  %418 = vst [vmem:[%s857_s28 + $0x48] sm:$0xff] %v619_v0  ;;  %v330_v2 = vpop.f32.mrb[9].mxu0 }
 0x10e   : > { %430 = vst [vmem:[%s857_s28 + $0xa8] sm:$0xff] %v637_v1  ;;  %v390_v3 = vpop.f32.mrb[9].mxu1  ;;  %417 = vst [vmem:[%s857_s28 + $0x40] sm:$0xff] %v330_v2 }
 0x10f   : > { %429 = vst [vmem:[%s857_s28 + $0xa0] sm:$0xff] %v390_v3 }
 0x110   : > { %v622_v4 = vpop.f32.mrb[10].mxu0 }
 0x111   : > { %v640_v5 = vpop.f32.mrb[10].mxu1  ;;  %420 = vst [vmem:[%s857_s28 + $0x58] sm:$0xff] %v622_v4  ;;  %v340_v6 = vpop.f32.mrb[11].mxu0 }
 0x112   : > { %432 = vst [vmem:[%s857_s28 + $0xb8] sm:$0xff] %v640_v5  ;;  %v400_v7 = vpop.f32.mrb[11].mxu1  ;;  %419 = vst [vmem:[%s857_s28 + $0x50] sm:$0xff] %v340_v6 }
 0x113   : > { %431 = vst [vmem:[%s857_s28 + $0xb0] sm:$0xff] %v400_v7 }
 0x114 PF: > { %s12_s11 = sadd.s32 1, %s735_s11   ;;  %s895_s9 = smov %s731_s10 }
 0x115   : > { %p9_p5 = scmp.ge.s32.totalorder %s12_s11, 4   ;;  %s896_s10 = smov %s898_s12 }
 0x117   :  { %11 = sbr.rel (!%p9_p5) target bundleno = 2 (0x2), region = 61 }

// kernel: graph_convolution.3
= control target key start
LH: loop header
LB: loop body
LE: loop exit
PB: predicated region body
PF: predicated region fallthrough
CT: control target
= control target key end

     0   :  { %s1325_s12 = smov 0   ;;  %s1327_s13 = smov 0   ;;  %s1696_s0 = inlined_call_operand.vmem [shape: f32[384,384], index: 0, kind: input, shape index: {}]   ;;  %s1697_s1 = inlined_call_operand.vmem [shape: f32[384,128], index: 1, kind: input, shape index: {}]   ;;  %s1698_s2 = inlined_call_operand.vmem [shape: f32[1,128], index: 2, kind: input, shape index: {}]   ;;  %s1699_s3 = inlined_call_operand.vmem [shape: f32[384,128], index: 3, kind: output, shape index: {}]  }
   0x1   :  { %s1329_s14 = smov 0  }
   0x2 LB: > { %s32_s15 = sadd.s32 1, %s1298_s13  ;;  %p1059_p0 = scmp.ge.s32.totalorder %s1302_s14, 1  ;;  %s1302_s14 = sphi %s1329_s14, %s13_s14   ;;  %s1298_s13 = sphi %s1327_s13, %s1701_s13   ;;  %s1294_s12 = sphi %s1325_s12, %s1700_s12  }
   0x3   : > { %p34_p1 = scmp.ge.s32.totalorder %s32_s15, 2  ;;  %p191_p2 = scmp.lt.s32.totalorder %s1302_s14, 3 }
   0x5   : > { %s1703_s15 = smov (%p34_p1, %s32_s15), 0  ;;  %p192_p3 = pnand %p1059_p0, %p191_p2 }
   0x6   : > { %v391_v0 = vld [vmem:[%s1697_s1] sm:$0xff] (!%p192_p3)  ;;  %v392_v1 = vld [vmem:[%s1697_s1 + $0x8] sm:$0xff] (!%p192_p3)  ;;  %v393_v2 = vld [vmem:[%s1697_s1 + $0x10] sm:$0xff] (!%p192_p3)  ;;  %s234_s22 = smul.u32 (!%p192_p3), 24, %s1294_s12  ;;  %v1304_v3 = vmov (!%p192_p3), 0.0|0.0  }
   0x7   : > { %195 = sbr.rel (%p192_p3) target bundleno = 381 (0x17d), region = 32  ;;  %1173 = vmatprep.subr.bf16.mxu0 (!%p192_p3), %v1304_v3  ;;  %v1174_v4 = vpack.c.bf16 (!%p192_p3), %v392_v1, %v391_v0  ;;  %v394_v5 = vld [vmem:[%s1697_s1 + $0x18] sm:$0xff] (!%p192_p3)  ;;  %v395_v7 = vld [vmem:[%s1697_s1 + $0x20] sm:$0xff] (!%p192_p3)  ;;  %v396_v8 = vld [vmem:[%s1697_s1 + $0x28] sm:$0xff] (!%p192_p3) }
   0x8   : > { %p236_p4 = scmp.lt.s32.totalorder (!%p192_p3), %s234_s22, 47  ;;  %v1177_v6 = vpack.c.bf16 (!%p192_p3), %v394_v5, %v393_v2  ;;  %v423_v9 = vld [vmem:[%s1697_s1 + $0x100] sm:$0xff] (!%p192_p3)  ;;  %v424_v10 = vld [vmem:[%s1697_s1 + $0x108] sm:$0xff] (!%p192_p3)  ;;  %v425_v12 = vld [vmem:[%s1697_s1 + $0x110] sm:$0xff] (!%p192_p3)  ;;  %v1180_v13 = vpack.c.bf16 (!%p192_p3), %v396_v8, %v395_v7 }
   0x9   : > { %1175 = vmatpush1.bf16.msra.mxu0 (!%p192_p3), %v1174_v4  ;;  %v1221_v11 = vpack.c.bf16 (!%p192_p3), %v424_v10, %v423_v9  ;;  %v397_v14 = vld [vmem:[%s1697_s1 + $0x30] sm:$0xff] (!%p192_p3)  ;;  %v426_v15 = vld [vmem:[%s1697_s1 + $0x118] sm:$0xff] (!%p192_p3)  ;;  %v427_v18 = vld [vmem:[%s1697_s1 + $0x120] sm:$0xff] (!%p192_p3) }
   0xa   : > { %1176 = vmatprep.subr.bf16.mxu0 (!%p192_p3), %v1304_v3  ;;  %v398_v16 = vld [vmem:[%s1697_s1 + $0x38] sm:$0xff] (!%p192_p3)  ;;  %v1225_v17 = vpack.c.bf16 (!%p192_p3), %v426_v15, %v425_v12  ;;  %v428_v19 = vld [vmem:[%s1697_s1 + $0x128] sm:$0xff] (!%p192_p3)  ;;  %v429_v22 = vld [vmem:[%s1697_s1 + $0x130] sm:$0xff] (!%p192_p3) }
   0xb   : > { %1222 = vmatprep.subr.bf16.mxu1 (!%p192_p3), %v1221_v11  ;;  %v1229_v20 = vpack.c.bf16 (!%p192_p3), %v428_v19, %v427_v18  ;;  %v1183_v21 = vpack.c.bf16 (!%p192_p3), %v398_v16, %v397_v14  ;;  %v430_v23 = vld [vmem:[%s1697_s1 + $0x138] sm:$0xff] (!%p192_p3)  ;;  %v399_v24 = vld [vmem:[%s1697_s1 + $0x40] sm:$0xff] (!%p192_p3)  ;;  %v400_v25 = vld [vmem:[%s1697_s1 + $0x48] sm:$0xff] (!%p192_p3) }
   0xc   : > { %1224 = vmatpush3.bf16.msra.mxu1 (!%p192_p3), %v1221_v11  ;;  %v1233_v26 = vpack.c.bf16 (!%p192_p3), %v430_v23, %v429_v22  ;;  %v1186_v27 = vpack.c.bf16 (!%p192_p3), %v400_v25, %v399_v24  ;;  %v401_v28 = vld [vmem:[%s1697_s1 + $0x50] sm:$0xff] (!%p192_p3)  ;;  %v431_v29 = vld [vmem:[%s1697_s1 + $0x140] sm:$0xff] (!%p192_p3)  ;;  %v432_v30 = vld [vmem:[%s1697_s1 + $0x148] sm:$0xff] (!%p192_p3) }
   0xd   : > { %1178 = vmatpush1.bf16.msra.mxu0 (!%p192_p3), %v1177_v6  ;;  %1226 = vmatprep.subr.bf16.mxu1 (!%p192_p3), %v1225_v17  ;;  %v402_v31 = vld [vmem:[%s1697_s1 + $0x58] sm:$0xff] (!%p192_p3)  ;;  %v1237_v34 = vpack.c.bf16 (!%p192_p3), %v432_v30, %v431_v29  ;;  %v433_v36 = vld [vmem:[%s1697_s1 + $0x150] sm:$0xff] (!%p192_p3)  ;;  %v403_v38 = vld [vmem:[%s1697_s1 + $0x60] sm:$0xff] (!%p192_p3) }
   0xe   : > { %s1705_s22 = smov (!%p236_p4, %s234_s22), 47  ;;  %1179 = vmatprep.subr.bf16.mxu0 %v1304_v3  ;;  %v1189_v35 = vpack.c.bf16 %v402_v31, %v401_v28  ;;  %v434_v37 = vld [vmem:[%s1697_s1 + $0x158] sm:$0xff]  ;;  %v404_v39 = vld [vmem:[%s1697_s1 + $0x68] sm:$0xff]  ;;  %v435_v42 = vld [vmem:[%s1697_s1 + $0x160] sm:$0xff] }
   0xf   : > { %s1253_s21 = smul.u32 24, %s1705_s22  ;;  %v1241_v40 = vpack.c.bf16 %v434_v37, %v433_v36  ;;  %v1192_v41 = vpack.c.bf16 %v404_v39, %v403_v38  ;;  %v436_v43 = vld [vmem:[%s1697_s1 + $0x168] sm:$0xff]  ;;  %v405_v44 = vld [vmem:[%s1697_s1 + $0x70] sm:$0xff]  ;;  %v406_v45 = vld [vmem:[%s1697_s1 + $0x78] sm:$0xff] }
  0x10   : > { %1228 = vmatpush3.bf16.msra.mxu1 %v1225_v17  ;;  %v1245_v46 = vpack.c.bf16 %v436_v43, %v435_v42  ;;  %v1195_v47 = vpack.c.bf16 %v406_v45, %v405_v44  ;;  %v437_v48 = vld [vmem:[%s1697_s1 + $0x170] sm:$0xff]  ;;  %v438_v49 = vld [vmem:[%s1697_s1 + $0x178] sm:$0xff]  ;;  %v407_v50 = vld [vmem:[%s1697_s1 + $0x80] sm:$0xff] }
  0x11   : > { %1181 = vmatpush1.bf16.msra.mxu0 %v1180_v13  ;;  %s1407_s6 = scalar_lea.vmem %s1696_s0, %s1253_s21  ;;  %1230 = vmatprep.subr.bf16.mxu1 %v1229_v20  ;;  %v408_v51 = vld [vmem:[%s1697_s1 + $0x88] sm:$0xff]  ;;  %v1249_v52 = vpack.c.bf16 %v438_v49, %v437_v48  ;;  %v409_v54 = vld [vmem:[%s1697_s1 + $0x90] sm:$0xff]  ;;  %v410_v55 = vld [vmem:[%s1697_s1 + $0x98] sm:$0xff] }
  0x12   : > { %1182 = vmatprep.subr.bf16.mxu0 %v1304_v3  ;;  %v321_v32 = vld [vmem:[%s1407_s6 + $0x10] sm:$0xff]  ;;  %v320_v33 = vld [vmem:[%s1407_s6 + $0x8] sm:$0xff]  ;;  %v1198_v53 = vpack.c.bf16 %v408_v51, %v407_v50  ;;  %v1201_v56 = vpack.c.bf16 %v410_v55, %v409_v54  ;;  %v411_v57 = vld [vmem:[%s1697_s1 + $0xa0] sm:$0xff] }
  0x13   : > { %1137 = vmatprep.mubr.f32.mxu1 %v321_v32  ;;  %503 = vmatprep.mubr.f32.mxu0 %v320_v33  ;;  %v412_v58 = vld [vmem:[%s1697_s1 + $0xa8] sm:$0xff]  ;;  %v327_v60 = vld [vmem:[%s1407_s6 + $0x40] sm:$0xff]  ;;  %v413_v62 = vld [vmem:[%s1697_s1 + $0xb0] sm:$0xff] }
  0x14   : > { %1232 = vmatpush3.bf16.msra.mxu1 %v1229_v20  ;;  %v324_v59 = vld [vmem:[%s1407_s6 + $0x28] sm:$0xff]  ;;  %v1204_v61 = vpack.c.bf16 %v412_v58, %v411_v57  ;;  %v414_v63 = vld [vmem:[%s1697_s1 + $0xb8] sm:$0xff]  ;;  %v333_v1 = vld [vmem:[%s1407_s6 + $0x70] sm:$0xff] }
  0x15   : > { %1184 = vmatpush1.bf16.msra.mxu0 %v1183_v21  ;;  %1234 = vmatprep.subr.bf16.mxu1 %v1233_v26  ;;  %v330_v0 = vld [vmem:[%s1407_s6 + $0x58] sm:$0xff]  ;;  %v1207_v2 = vpack.c.bf16 %v414_v63, %v413_v62  ;;  %v415_v4 = vld [vmem:[%s1697_s1 + $0xc0] sm:$0xff]  ;;  %v416_v5 = vld [vmem:[%s1697_s1 + $0xc8] sm:$0xff] }
  0x16   : > { %1185 = vmatprep.subr.bf16.mxu0 %v1304_v3  ;;  %v336_v6 = vld [vmem:[%s1407_s6 + $0x88] sm:$0xff]  ;;  %v339_v7 = vld [vmem:[%s1407_s6 + $0xa0] sm:$0xff]  ;;  %v1210_v8 = vpack.c.bf16 %v416_v5, %v415_v4  ;;  %v417_v9 = vld [vmem:[%s1697_s1 + $0xd0] sm:$0xff] }
  0x17   : > { %v418_v10 = vld [vmem:[%s1697_s1 + $0xd8] sm:$0xff]  ;;  %v345_v12 = vld [vmem:[%s1407_s6 + $0xd0] sm:$0xff]  ;;  %v419_v14 = vld [vmem:[%s1697_s1 + $0xe0] sm:$0xff] }
  0x18   : > { %1236 = vmatpush3.bf16.msra.mxu1 %v1233_v26  ;;  %v342_v11 = vld [vmem:[%s1407_s6 + $0xb8] sm:$0xff]  ;;  %v1213_v13 = vpack.c.bf16 %v418_v10, %v417_v9  ;;  %v420_v15 = vld [vmem:[%s1697_s1 + $0xe8] sm:$0xff]  ;;  %v351_v17 = vld [vmem:[%s1407_s6 + $0x100] sm:$0xff] }
  0x19   : > { %1187 = vmatpush1.bf16.msra.mxu0 %v1186_v27  ;;  %1238 = vmatprep.subr.bf16.mxu1 %v1237_v34  ;;  %v348_v16 = vld [vmem:[%s1407_s6 + $0xe8] sm:$0xff]  ;;  %v1216_v18 = vpack.c.bf16 %v420_v15, %v419_v14  ;;  %v421_v19 = vld [vmem:[%s1697_s1 + $0xf0] sm:$0xff]  ;;  %v422_v20 = vld [vmem:[%s1697_s1 + $0xf8] sm:$0xff] }
  0x1a   : > { %1188 = vmatprep.subr.bf16.mxu0 %v1304_v3  ;;  %v354_v21 = vld [vmem:[%s1407_s6 + $0x118] sm:$0xff]  ;;  %v357_v22 = vld [vmem:[%s1407_s6 + $0x130] sm:$0xff]  ;;  %v1219_v23 = vpack.c.bf16 %v422_v20, %v421_v19  ;;  %v360_v24 = vld [vmem:[%s1407_s6 + $0x148] sm:$0xff] }
  0x1b   : > { %v363_v25 = vld [vmem:[%s1407_s6 + $0x160] sm:$0xff]  ;;  %v366_v28 = vld [vmem:[%s1407_s6 + $0x178] sm:$0xff]  ;;  %v369_v29 = vld [vmem:[%s1407_s6 + $0x190] sm:$0xff] }
  0x1c   : > { %1240 = vmatpush3.bf16.msra.mxu1 %v1237_v34  ;;  %v319_v26 = vld [vmem:[%s1407_s6] sm:$0xff]  ;;  %v326_v30 = vld [vmem:[%s1407_s6 + $0x38] sm:$0xff]  ;;  %v372_v31 = vld [vmem:[%s1407_s6 + $0x1a8] sm:$0xff] }
  0x1d   : > { %1190 = vmatpush1.bf16.msra.mxu0 %v1189_v35  ;;  %1242 = vmatprep.subr.bf16.mxu1 %v1241_v40  ;;  %v323_v27 = vld [vmem:[%s1407_s6 + $0x20] sm:$0xff]  ;;  %v325_v33 = vld [vmem:[%s1407_s6 + $0x30] sm:$0xff]  ;;  %v378_v35 = vld [vmem:[%s1407_s6 + $0x1d8] sm:$0xff] }
  0x1e   : > { %1191 = vmatprep.subr.bf16.mxu0 %v1304_v3  ;;  %v375_v32 = vld [vmem:[%s1407_s6 + $0x1c0] sm:$0xff]  ;;  %v329_v34 = vld [vmem:[%s1407_s6 + $0x50] sm:$0xff]  ;;  %v328_v37 = vld [vmem:[%s1407_s6 + $0x48] sm:$0xff] }
  0x1f   : > { %v381_v36 = vld [vmem:[%s1407_s6 + $0x1f0] sm:$0xff]  ;;  %v332_v38 = vld [vmem:[%s1407_s6 + $0x68] sm:$0xff]  ;;  %v335_v42 = vld [vmem:[%s1407_s6 + $0x80] sm:$0xff] }
  0x20   : > { %1244 = vmatpush3.bf16.msra.mxu1 %v1241_v40  ;;  %v384_v39 = vld [vmem:[%s1407_s6 + $0x208] sm:$0xff]  ;;  %v387_v40 = vld [vmem:[%s1407_s6 + $0x220] sm:$0xff]  ;;  %v390_v43 = vld [vmem:[%s1407_s6 + $0x238] sm:$0xff] }
  0x21   : > { %1193 = vmatpush1.bf16.msra.mxu0 %v1192_v41  ;;  %1246 = vmatprep.subr.bf16.mxu1 %v1245_v46  ;;  %v331_v41 = vld [vmem:[%s1407_s6 + $0x60] sm:$0xff]  ;;  %v334_v44 = vld [vmem:[%s1407_s6 + $0x78] sm:$0xff]  ;;  %v340_v48 = vld [vmem:[%s1407_s6 + $0xa8] sm:$0xff] }
  0x22   : > { %1194 = vmatprep.subr.bf16.mxu0 %v1304_v3  ;;  %v338_v45 = vld [vmem:[%s1407_s6 + $0x98] sm:$0xff]  ;;  %v344_v49 = vld [vmem:[%s1407_s6 + $0xc8] sm:$0xff]  ;;  %v343_v50 = vld [vmem:[%s1407_s6 + $0xc0] sm:$0xff] }
  0x23   : > { %v347_v51 = vld [vmem:[%s1407_s6 + $0xe0] sm:$0xff]  ;;  %v349_v54 = vld [vmem:[%s1407_s6 + $0xf0] sm:$0xff]  ;;  %v356_v57 = vld [vmem:[%s1407_s6 + $0x128] sm:$0xff] }
  0x24   : > { %1248 = vmatpush3.bf16.msra.mxu1 %v1245_v46  ;;  %v337_v46 = vld [vmem:[%s1407_s6 + $0x90] sm:$0xff]  ;;  %v355_v58 = vld [vmem:[%s1407_s6 + $0x120] sm:$0xff]  ;;  %v370_v5 = vld [vmem:[%s1407_s6 + $0x198] sm:$0xff] }
  0x25   : > { %1196 = vmatpush1.bf16.msra.mxu0 %v1195_v47  ;;  %1250 = vmatprep.subr.bf16.mxu1 %v1249_v52  ;;  %v341_v47 = vld [vmem:[%s1407_s6 + $0xb0] sm:$0xff]  ;;  %v371_v4 = vld [vmem:[%s1407_s6 + $0x1a0] sm:$0xff]  ;;  %v376_v9 = vld [vmem:[%s1407_s6 + $0x1c8] sm:$0xff] }
  0x26   : > { %1197 = vmatprep.subr.bf16.mxu0 %v1304_v3  ;;  %v353_v55 = vld [vmem:[%s1407_s6 + $0x110] sm:$0xff]  ;;  %v380_v10 = vld [vmem:[%s1407_s6 + $0x1e8] sm:$0xff]  ;;  %v386_v14 = vld [vmem:[%s1407_s6 + $0x218] sm:$0xff] }
  0x27   : > { %v361_v62 = vld [vmem:[%s1407_s6 + $0x150] sm:$0xff] }
  0x28   : > { %1252 = vmatpush3.bf16.msra.mxu1 %v1249_v52  ;;  %v346_v52 = vld [vmem:[%s1407_s6 + $0xd8] sm:$0xff]  ;;  %v365_v63 = vld [vmem:[%s1407_s6 + $0x170] sm:$0xff] }
  0x29   : > { %1199 = vmatpush1.bf16.msra.mxu0 %v1198_v53  ;;  %v350_v53 = vld [vmem:[%s1407_s6 + $0xf8] sm:$0xff]  ;;  %v385_v15 = vld [vmem:[%s1407_s6 + $0x210] sm:$0xff] }
  0x2a   : > { %1200 = vmatprep.subr.bf16.mxu0 %v1304_v3 }
  0x2b   : > { %1138 = vmatmul.mubr.f32.vlgmr.msra.gmra.mrb[0].mxu1 %v324_v59  ;;  %v359_v59 = vld [vmem:[%s1407_s6 + $0x140] sm:$0xff] }
  0x2c   : > { %1140 = vmatprep.mubr.f32.mxu1 %v327_v60  ;;  %v358_v60 = vld [vmem:[%s1407_s6 + $0x138] sm:$0xff] }
  0x2d   : > { %1202 = vmatpush1.bf16.msra.mxu0 %v1201_v56  ;;  %v352_v56 = vld [vmem:[%s1407_s6 + $0x108] sm:$0xff] }
  0x2e   : > { %1203 = vmatprep.subr.bf16.mxu0 %v1304_v3 }
  0x2f   : > { %1141 = vmatmul.mubr.f32.gmra.mrb[2].mxu1 %v330_v0  ;;  %v364_v0 = vld [vmem:[%s1407_s6 + $0x168] sm:$0xff] }
  0x30   : > { %1143 = vmatprep.mubr.f32.mxu1 %v333_v1  ;;  %v368_v1 = vld [vmem:[%s1407_s6 + $0x188] sm:$0xff] }
  0x31   : > { %1205 = vmatpush1.bf16.msra.mxu0 %v1204_v61  ;;  %v362_v61 = vld [vmem:[%s1407_s6 + $0x158] sm:$0xff] }
  0x32   : > { %1206 = vmatprep.subr.bf16.mxu0 %v1304_v3 }
  0x33   : > { %1144 = vmatmul.mubr.f32.gmra.mrb[4].mxu1 %v336_v6  ;;  %v374_v6 = vld [vmem:[%s1407_s6 + $0x1b8] sm:$0xff] }
  0x34   : > { %1146 = vmatprep.mubr.f32.mxu1 %v339_v7  ;;  %v373_v7 = vld [vmem:[%s1407_s6 + $0x1b0] sm:$0xff] }
  0x35   : > { %1208 = vmatpush1.bf16.msra.mxu0 %v1207_v2  ;;  %v367_v2 = vld [vmem:[%s1407_s6 + $0x180] sm:$0xff] }
  0x36   : > { %1209 = vmatprep.subr.bf16.mxu0 %v1304_v3 }
  0x37   : > { %1147 = vmatmul.mubr.f32.gmra.mrb[6].mxu1 %v342_v11  ;;  %v379_v11 = vld [vmem:[%s1407_s6 + $0x1e0] sm:$0xff] }
  0x38   : > { %1149 = vmatprep.mubr.f32.mxu1 %v345_v12  ;;  %v383_v12 = vld [vmem:[%s1407_s6 + $0x200] sm:$0xff] }
  0x39   : > { %1211 = vmatpush1.bf16.msra.mxu0 %v1210_v8  ;;  %v377_v8 = vld [vmem:[%s1407_s6 + $0x1d0] sm:$0xff] }
  0x3a   : > { %1212 = vmatprep.subr.bf16.mxu0 %v1304_v3 }
  0x3b   : > { %1150 = vmatmul.mubr.f32.gmra.mrb[8].mxu1 %v348_v16  ;;  %v389_v16 = vld [vmem:[%s1407_s6 + $0x230] sm:$0xff] }
  0x3c   : > { %1152 = vmatprep.mubr.f32.mxu1 %v351_v17  ;;  %v388_v17 = vld [vmem:[%s1407_s6 + $0x228] sm:$0xff] }
  0x3d   : > { %1214 = vmatpush1.bf16.msra.mxu0 %v1213_v13  ;;  %v382_v13 = vld [vmem:[%s1407_s6 + $0x1f8] sm:$0xff] }
  0x3e   : > { %1215 = vmatprep.subr.bf16.mxu0 %v1304_v3 }
  0x3f   : > { %1153 = vmatmul.mubr.f32.gmra.mrb[10].mxu1 %v354_v21 }
  0x40   : > { %1155 = vmatprep.mubr.f32.mxu1 %v357_v22 }
  0x41   : > { %1217 = vmatpush1.bf16.msra.mxu0 %v1216_v18 }
  0x42   : > { %1218 = vmatprep.subr.bf16.mxu0 %v1304_v3  ;;  %v322_v3 = vld [vmem:[%s1407_s6 + $0x18] sm:$0xff]  ;;  %s1061_s6 = sshll.u32 %s1705_s22, 3 }
  0x43   : > { %1156 = vmatmul.mubr.f32.gmra.mrb[12].mxu1 %v360_v24  ;;  %s1606_s4 = scalar_lea.vmem %s1699_s3, %s1061_s6 }
  0x44   : > { %1158 = vmatprep.mubr.f32.mxu1 %v363_v25 }
  0x45   : > { %1220 = vmatpush1.bf16.msra.mxu0 %v1219_v23 }
  0x47   : > { %1159 = vmatmul.mubr.f32.gmra.mrb[14].mxu1 %v366_v28 }
  0x48   : > { %504 = vmatmul.mubr.f32.vlgmr.msra.gmra.mrb[0].mxu0 %v319_v26  ;;  %1161 = vmatprep.mubr.f32.mxu1 %v369_v29 }
  0x49   : > { %508 = vmatprep.mubr.f32.mxu0 %v323_v27 }
  0x4b   : > { %1162 = vmatmul.mubr.f32.gmra.mrb[16].mxu1 %v372_v31 }
  0x4c   : > { %509 = vmatmul.mubr.f32.gmra.mrb[2].mxu0 %v322_v3  ;;  %1164 = vmatprep.mubr.f32.mxu1 %v375_v32 }
  0x4d   : > { %513 = vmatprep.mubr.f32.mxu0 %v326_v30 }
  0x4f   : > { %1165 = vmatmul.mubr.f32.gmra.mrb[18].mxu1 %v378_v35 }
  0x50   : > { %514 = vmatmul.mubr.f32.gmra.mrb[4].mxu0 %v325_v33  ;;  %1167 = vmatprep.mubr.f32.mxu1 %v381_v36 }
  0x51   : > { %518 = vmatprep.mubr.f32.mxu0 %v329_v34  ;;  %v1597_v34 = vld [vmem:[%s1698_s2] ss:$0 sm:$0xff] }
  0x53   : > { %1168 = vmatmul.mubr.f32.gmra.mrb[20].mxu1 %v384_v39 }
  0x54   : > { %519 = vmatmul.mubr.f32.gmra.mrb[6].mxu0 %v328_v37  ;;  %1170 = vmatprep.mubr.f32.mxu1 %v387_v40 }
  0x55   : > { %523 = vmatprep.mubr.f32.mxu0 %v332_v38 }
  0x57   : > { %1171 = vmatmul.mubr.f32.gmra.mrb[22].mxu1 %v390_v43 }
  0x58   : > { %524 = vmatmul.mubr.f32.gmra.mrb[8].mxu0 %v331_v41 }
  0x59   : > { %528 = vmatprep.mubr.f32.mxu0 %v335_v42 }
  0x5c   : > { %529 = vmatmul.mubr.f32.gmra.mrb[10].mxu0 %v334_v44 }
  0x5d   : > { %533 = vmatprep.mubr.f32.mxu0 %v338_v45 }
  0x60   : > { %534 = vmatmul.mubr.f32.gmra.mrb[12].mxu0 %v337_v46 }
  0x61   : > { %538 = vmatprep.mubr.f32.mxu0 %v341_v47 }
  0x64   : > { %539 = vmatmul.mubr.f32.gmra.mrb[14].mxu0 %v340_v48 }
  0x65   : > { %543 = vmatprep.mubr.f32.mxu0 %v344_v49 }
  0x68   : > { %544 = vmatmul.mubr.f32.gmra.mrb[16].mxu0 %v343_v50 }
  0x69   : > { %548 = vmatprep.mubr.f32.mxu0 %v347_v51 }
  0x6c   : > { %549 = vmatmul.mubr.f32.gmra.mrb[18].mxu0 %v346_v52 }
  0x6d   : > { %553 = vmatprep.mubr.f32.mxu0 %v350_v53 }
  0x70   : > { %554 = vmatmul.mubr.f32.gmra.mrb[20].mxu0 %v349_v54 }
  0x71   : > { %558 = vmatprep.mubr.f32.mxu0 %v353_v55 }
  0x74   : > { %559 = vmatmul.mubr.f32.gmra.mrb[22].mxu0 %v352_v56 }
  0x75   : > { %563 = vmatprep.mubr.f32.mxu0 %v356_v57 }
  0x78   : > { %564 = vmatmul.mubr.f32.gmra.mrb[24].mxu0 %v355_v58 }
  0x79   : > { %568 = vmatprep.mubr.f32.mxu0 %v359_v59 }
  0x7c   : > { %569 = vmatmul.mubr.f32.gmra.mrb[26].mxu0 %v358_v60 }
  0x7d   : > { %573 = vmatprep.mubr.f32.mxu0 %v362_v61 }
  0x80   : > { %574 = vmatmul.mubr.f32.gmra.mrb[28].mxu0 %v361_v62 }
  0x81   : > { %578 = vmatprep.mubr.f32.mxu0 %v365_v63 }
  0x84   : > { %579 = vmatmul.mubr.f32.gmra.mrb[30].mxu0 %v364_v0 }
  0x85   : > { %583 = vmatprep.mubr.f32.mxu0 %v368_v1 }
  0x88   : > { %584 = vmatmul.mubr.f32.gmra.mrb[32].mxu0 %v367_v2 }
  0x89   : > { %588 = vmatprep.mubr.f32.mxu0 %v371_v4 }
  0x8c   : > { %589 = vmatmul.mubr.f32.gmra.mrb[34].mxu0 %v370_v5 }
  0x8d   : > { %593 = vmatprep.mubr.f32.mxu0 %v374_v6 }
  0x90   : > { %594 = vmatmul.mubr.f32.gmra.mrb[36].mxu0 %v373_v7 }
  0x91   : > { %598 = vmatprep.mubr.f32.mxu0 %v377_v8 }
  0x94   : > { %599 = vmatmul.mubr.f32.gmra.mrb[38].mxu0 %v376_v9 }
  0x95   : > { %603 = vmatprep.mubr.f32.mxu0 %v380_v10 }
  0x98   : > { %604 = vmatmul.mubr.f32.gmra.mrb[40].mxu0 %v379_v11 }
  0x99   : > { %608 = vmatprep.mubr.f32.mxu0 %v383_v12 }
  0x9c   : > { %609 = vmatmul.mubr.f32.gmra.mrb[42].mxu0 %v382_v13 }
  0x9d   : > { %613 = vmatprep.mubr.f32.mxu0 %v386_v14 }
  0xa0   : > { %614 = vmatmul.mubr.f32.gmra.mrb[44].mxu0 %v385_v15 }
  0xa1   : > { %618 = vmatprep.mubr.f32.mxu0 %v389_v16 }
  0xa4   : > { %619 = vmatmul.mubr.f32.gmra.mrb[46].mxu0 %v388_v17 }
  0xfe   : > { %v1139_v18 = vpop.f32.mrb[0].mxu1 }
  0xff   : > { %v690_v19 = vpop.f32.mrb[1].mxu1 }
 0x102   : > { %v1142_v20 = vpop.f32.mrb[2].mxu1 }
 0x103   : > { %v700_v21 = vpop.f32.mrb[3].mxu1 }
 0x106   : > { %v1145_v22 = vpop.f32.mrb[4].mxu1 }
 0x107   : > { %v710_v23 = vpop.f32.mrb[5].mxu1 }
 0x10a   : > { %v1148_v24 = vpop.f32.mrb[6].mxu1 }
 0x10b   : > { %v720_v25 = vpop.f32.mrb[7].mxu1 }
 0x10e   : > { %v1583_v26 = vpop.f32.mrb[8].mxu1 }
 0x10f   : > { %v730_v27 = vpop.f32.mrb[9].mxu1 }
 0x112   : > { %v1585_v28 = vpop.f32.mrb[10].mxu1 }
 0x113   : > { %v1587_v29 = vpop.f32.mrb[11].mxu1 }
 0x116   : > { %v1589_v3 = vpop.f32.mrb[12].mxu1 }
 0x117   : > { %v1591_v30 = vpop.f32.mrb[13].mxu1 }
 0x11a   : > { %v1599_v35 = vpop.f32.mrb[14].mxu1 }
 0x11b   : > { %v505_v31 = vpop.f32.mrb[0].mxu0  ;;  %v1601_v36 = vpop.f32.mrb[15].mxu1 }
 0x11c   : > { %v691_v32 = vadd.f32 %v690_v19, %v505_v31  ;;  %v507_v33 = vpop.f32.mrb[1].mxu0 }
 0x11e   : > { %v891_v38 = vadd.f32 %v1597_v34, %v691_v32  ;;  %v1609_v41 = vpop.f32.mrb[16].mxu1 }
 0x11f   : > { %v510_v37 = vpop.f32.mrb[2].mxu0  ;;  %v1612_v42 = vpop.f32.mrb[17].mxu1 }
 0x120   : > { %v696_v39 = vadd.f32 %v1139_v18, %v510_v37  ;;  %v512_v40 = vpop.f32.mrb[3].mxu0  ;;  %915 = vst [vmem:[%s1606_s4] sm:$0xff] %v891_v38 }
 0x122   : > { %v892_v44 = vadd.f32 %v1597_v34, %v696_v39  ;;  %v1615_v47 = vpop.f32.mrb[18].mxu1 }
 0x123   : > { %v515_v43 = vpop.f32.mrb[4].mxu0  ;;  %v1618_v48 = vpop.f32.mrb[19].mxu1 }
 0x124   : > { %v701_v45 = vadd.f32 %v700_v21, %v515_v43  ;;  %v517_v46 = vpop.f32.mrb[5].mxu0  ;;  %916 = vst [vmem:[%s1606_s4 + $0x8] sm:$0xff] %v892_v44 }
 0x126   : > { %v893_v50 = vadd.f32 %v1597_v34, %v701_v45  ;;  %v1621_v53 = vpop.f32.mrb[20].mxu1 }
 0x127   : > { %v520_v49 = vpop.f32.mrb[6].mxu0  ;;  %v1624_v54 = vpop.f32.mrb[21].mxu1 }
 0x128   : > { %v706_v51 = vadd.f32 %v1142_v20, %v520_v49  ;;  %v522_v52 = vpop.f32.mrb[7].mxu0  ;;  %917 = vst [vmem:[%s1606_s4 + $0x10] sm:$0xff] %v893_v50 }
 0x12a   : > { %v894_v56 = vadd.f32 %v1597_v34, %v706_v51  ;;  %v1627_v59 = vpop.f32.mrb[22].mxu1 }
 0x12b   : > { %v525_v55 = vpop.f32.mrb[8].mxu0  ;;  %v1630_v60 = vpop.f32.mrb[23].mxu1 }
 0x12c   : > { %v711_v57 = vadd.f32 %v710_v23, %v525_v55  ;;  %v527_v58 = vpop.f32.mrb[9].mxu0  ;;  %918 = vst [vmem:[%s1606_s4 + $0x18] sm:$0xff] %v894_v56 }
 0x12e   : > { %v895_v62 = vadd.f32 %v1597_v34, %v711_v57 }
 0x12f   : > { %v530_v61 = vpop.f32.mrb[10].mxu0 }
 0x130   : > { %v716_v63 = vadd.f32 %v1145_v22, %v530_v61  ;;  %v532_v0 = vpop.f32.mrb[11].mxu0  ;;  %919 = vst [vmem:[%s1606_s4 + $0x20] sm:$0xff] %v895_v62 }
 0x132   : > { %v896_v2 = vadd.f32 %v1597_v34, %v716_v63 }
 0x133   : > { %v535_v1 = vpop.f32.mrb[12].mxu0 }
 0x134   : > { %v721_v4 = vadd.f32 %v720_v25, %v535_v1  ;;  %v537_v5 = vpop.f32.mrb[13].mxu0  ;;  %920 = vst [vmem:[%s1606_s4 + $0x28] sm:$0xff] %v896_v2 }
 0x136   : > { %v897_v7 = vadd.f32 %v1597_v34, %v721_v4 }
 0x137   : > { %v540_v6 = vpop.f32.mrb[14].mxu0 }
 0x138   : > { %v726_v8 = vadd.f32 %v1148_v24, %v540_v6  ;;  %v542_v9 = vpop.f32.mrb[15].mxu0  ;;  %921 = vst [vmem:[%s1606_s4 + $0x30] sm:$0xff] %v897_v7 }
 0x13a   : > { %v898_v11 = vadd.f32 %v1597_v34, %v726_v8 }
 0x13b   : > { %v545_v10 = vpop.f32.mrb[16].mxu0 }
 0x13c   : > { %v731_v12 = vadd.f32 %v730_v27, %v545_v10  ;;  %v547_v13 = vpop.f32.mrb[17].mxu0  ;;  %922 = vst [vmem:[%s1606_s4 + $0x38] sm:$0xff] %v898_v11 }
 0x13e   : > { %v899_v15 = vadd.f32 %v1597_v34, %v731_v12 }
 0x13f   : > { %v550_v14 = vpop.f32.mrb[18].mxu0 }
 0x140   : > { %v736_v16 = vadd.f32 %v1583_v26, %v550_v14  ;;  %v552_v17 = vpop.f32.mrb[19].mxu0  ;;  %923 = vst [vmem:[%s1606_s4 + $0x40] sm:$0xff] %v899_v15 }
 0x142   : > { %v900_v19 = vadd.f32 %v1597_v34, %v736_v16 }
 0x143   : > { %v555_v18 = vpop.f32.mrb[20].mxu0 }
 0x144   : > { %v741_v20 = vadd.f32 %v1587_v29, %v555_v18  ;;  %v557_v21 = vpop.f32.mrb[21].mxu0  ;;  %924 = vst [vmem:[%s1606_s4 + $0x48] sm:$0xff] %v900_v19 }
 0x146   : > { %v901_v23 = vadd.f32 %v1597_v34, %v741_v20 }
 0x147   : > { %v560_v22 = vpop.f32.mrb[22].mxu0 }
 0x148   : > { %v746_v24 = vadd.f32 %v1585_v28, %v560_v22  ;;  %v562_v25 = vpop.f32.mrb[23].mxu0  ;;  %925 = vst [vmem:[%s1606_s4 + $0x50] sm:$0xff] %v901_v23 }
 0x14a   : > { %v902_v27 = vadd.f32 %v1597_v34, %v746_v24 }
 0x14b   : > { %v565_v26 = vpop.f32.mrb[24].mxu0 }
 0x14c   : > { %v751_v31 = vadd.f32 %v1591_v30, %v565_v26  ;;  %v567_v32 = vpop.f32.mrb[25].mxu0  ;;  %926 = vst [vmem:[%s1606_s4 + $0x58] sm:$0xff] %v902_v27 }
 0x14e   : > { %v903_v33 = vadd.f32 %v1597_v34, %v751_v31 }
 0x14f   : > { %v570_v29 = vpop.f32.mrb[26].mxu0 }
 0x150   : > { %v756_v37 = vadd.f32 %v1589_v3, %v570_v29  ;;  %v572_v38 = vpop.f32.mrb[27].mxu0  ;;  %927 = vst [vmem:[%s1606_s4 + $0x60] sm:$0xff] %v903_v33 }
 0x152   : > { %v904_v39 = vadd.f32 %v1597_v34, %v756_v37 }
 0x153   : > { %v575_v28 = vpop.f32.mrb[28].mxu0 }
 0x154   : > { %v761_v40 = vadd.f32 %v1601_v36, %v575_v28  ;;  %v577_v43 = vpop.f32.mrb[29].mxu0  ;;  %928 = vst [vmem:[%s1606_s4 + $0x68] sm:$0xff] %v904_v39 }
 0x156   : > { %v905_v44 = vadd.f32 %v1597_v34, %v761_v40 }
 0x157   : > { %v580_v30 = vpop.f32.mrb[30].mxu0 }
 0x158   : > { %v766_v45 = vadd.f32 %v1599_v35, %v580_v30  ;;  %v582_v46 = vpop.f32.mrb[31].mxu0  ;;  %929 = vst [vmem:[%s1606_s4 + $0x70] sm:$0xff] %v905_v44 }
 0x15a   : > { %v906_v49 = vadd.f32 %v1597_v34, %v766_v45 }
 0x15b   : > { %v585_v3 = vpop.f32.mrb[32].mxu0 }
 0x15c   : > { %v771_v50 = vadd.f32 %v1612_v42, %v585_v3  ;;  %v587_v51 = vpop.f32.mrb[33].mxu0  ;;  %930 = vst [vmem:[%s1606_s4 + $0x78] sm:$0xff] %v906_v49 }
 0x15e   : > { %v907_v52 = vadd.f32 %v1597_v34, %v771_v50 }
 0x15f   : > { %v590_v36 = vpop.f32.mrb[34].mxu0 }
 0x160   : > { %v776_v55 = vadd.f32 %v1609_v41, %v590_v36  ;;  %v592_v56 = vpop.f32.mrb[35].mxu0  ;;  %931 = vst [vmem:[%s1606_s4 + $0x80] sm:$0xff] %v907_v52 }
 0x162   : > { %v908_v57 = vadd.f32 %v1597_v34, %v776_v55 }
 0x163   : > { %v595_v35 = vpop.f32.mrb[36].mxu0 }
 0x164   : > { %v781_v58 = vadd.f32 %v1618_v48, %v595_v35  ;;  %v597_v61 = vpop.f32.mrb[37].mxu0  ;;  %932 = vst [vmem:[%s1606_s4 + $0x88] sm:$0xff] %v908_v57 }
 0x166   : > { %v909_v62 = vadd.f32 %v1597_v34, %v781_v58 }
 0x167   : > { %v600_v42 = vpop.f32.mrb[38].mxu0 }
 0x168   : > { %v786_v63 = vadd.f32 %v1615_v47, %v600_v42  ;;  %v602_v0 = vpop.f32.mrb[39].mxu0  ;;  %933 = vst [vmem:[%s1606_s4 + $0x90] sm:$0xff] %v909_v62 }
 0x16a   : > { %v910_v1 = vadd.f32 %v1597_v34, %v786_v63 }
 0x16b   : > { %v605_v41 = vpop.f32.mrb[40].mxu0 }
 0x16c   : > { %v791_v2 = vadd.f32 %v1624_v54, %v605_v41  ;;  %v607_v4 = vpop.f32.mrb[41].mxu0  ;;  %934 = vst [vmem:[%s1606_s4 + $0x98] sm:$0xff] %v910_v1 }
 0x16e   : > { %v911_v5 = vadd.f32 %v1597_v34, %v791_v2 }
 0x16f   : > { %v610_v48 = vpop.f32.mrb[42].mxu0 }
 0x170   : > { %v796_v6 = vadd.f32 %v1621_v53, %v610_v48  ;;  %v612_v7 = vpop.f32.mrb[43].mxu0  ;;  %935 = vst [vmem:[%s1606_s4 + $0xa0] sm:$0xff] %v911_v5 }
 0x172   : > { %v912_v8 = vadd.f32 %v1597_v34, %v796_v6 }
 0x173   : > { %v615_v47 = vpop.f32.mrb[44].mxu0 }
 0x174   : > { %v801_v9 = vadd.f32 %v1630_v60, %v615_v47  ;;  %v617_v10 = vpop.f32.mrb[45].mxu0  ;;  %936 = vst [vmem:[%s1606_s4 + $0xa8] sm:$0xff] %v912_v8 }
 0x176   : > { %v913_v54 = vadd.f32 %v1597_v34, %v801_v9 }
 0x177   : > { %v620_v11 = vpop.f32.mrb[46].mxu0 }
 0x178   : > { %v806_v12 = vadd.f32 %v1627_v59, %v620_v11  ;;  %v622_v13 = vpop.f32.mrb[47].mxu0  ;;  %937 = vst [vmem:[%s1606_s4 + $0xb0] sm:$0xff] %v913_v54 }
 0x17a   : > { %v914_v14 = vadd.f32 %v1597_v34, %v806_v12 }
 0x17c   : > { %938 = vst [vmem:[%s1606_s4 + $0xb8] sm:$0xff] %v914_v14 }
 0x17d PF: > { %s13_s14 = sadd.s32 1, %s1302_s14   ;;  %s1700_s12 = smov %s1298_s13 }
 0x17e   : > { %p10_p5 = scmp.ge.s32.totalorder %s13_s14, 4   ;;  %s1701_s13 = smov %s1703_s15 }
 0x180   :  { %12 = sbr.rel (!%p10_p5) target bundleno = 2 (0x2), region = 76 }

</bundles_post_ra>
